<compile_context>
chip_gen: v5e
topology: v5e:2x2
jax: 0.10.0
libtpu: 0.0.40
codegen_flags: <defaults>
</compile_context>

<pallas_src>
import functools

import jax
import jax.numpy as jnp
from jax.experimental import pallas as pl
from jax.experimental.pallas import tpu as pltpu

_MIB = 1 << 20


def _vmem_capacity_bytes():
    """Physical VMEM per TensorCore, with conservative fallbacks."""
    try:
        return int(pltpu.get_tpu_info().vmem_capacity_bytes)
    except Exception:
        pass
    try:
        kind = jax.devices()[0].device_kind.lower()
        if "v7" in kind:
            return 64 * _MIB       # v7x: 64 MiB per TC
        return 128 * _MIB          # v5e / v6e (and v4/v5p)
    except Exception:
        return 64 * _MIB           # safe default


def _pick_row_tile(nc, hw, dtype_bytes, target_block_bytes):
    """Largest row tile that (a) is a multiple of 8, (b) divides nc, and
    (c) keeps one (rows, hw) block within the byte budget."""
    cap = max(8, target_block_bytes // max(1, hw * dtype_bytes))
    # Keep >= 2 grid steps when possible so dimension_semantics=("parallel",)
    # can actually shard rows across v7x's 2 TensorCores.
    if nc >= 16:
        cap = min(cap, nc // 2)
    cap = min(cap, nc)
    best = 8
    t = 8
    while t <= cap:
        if nc % t == 0:
            best = t
        t += 8
    return best


def _fcsa_kernel(x_ref, o_ref, *, inv_hw):
    # x_ref / o_ref: (row_tile, HW) block resident in VMEM.
    x = x_ref[...]
    # AdaptiveAvgPool2d((1,1)): per-row spatial mean.  Reduce in f32 for
    # accuracy, but do NOT upcast the whole block — the bulk multiply stays
    # in the input dtype (halves vreg/VMEM traffic for bf16 on v6e/v7x).
    mean = jnp.sum(x, axis=-1, keepdims=True, dtype=jnp.float32) * inv_hw
    gate = jax.nn.sigmoid(mean).astype(x.dtype)    # (row_tile, 1)
    o_ref[...] = x * gate                          # broadcast over spatial axis


def fcsa_forward(x_nchw):
    """FCSA forward. x_nchw: (N, C, H, W) -> (N, C, H, W)."""
    N, C, H, W = x_nchw.shape
    NC, HW = N * C, H * W
    x2d = x_nchw.reshape(NC, HW)
    dtype_bytes = jnp.dtype(x_nchw.dtype).itemsize

    # Pad rows to a multiple of 8 so we never need a single full-extent block.
    # Padded rows are zero; each row's pooling/gating is independent, so the
    # padding cannot contaminate real rows (it is sliced off afterwards).
    nc_pad = (-NC) % 8
    if nc_pad:
        x2d = jnp.pad(x2d, ((0, nc_pad), (0, 0)))
    NCp = NC + nc_pad

    # Byte-budget tiling: one block ~2-4 MiB.  With double buffering
    # (2 input + 2 output buffers) the resident working set is ~8-16 MiB,
    # which fits every generation (v7x: 64 MiB physical; v5e/v6e: 128 MiB)
    # while being big enough to amortize the ~0.35 us/step pipeline overhead.
    vmem_cap = _vmem_capacity_bytes()
    target_block_bytes = 4 * _MIB if vmem_cap >= 128 * _MIB else 2 * _MIB
    row_tile = _pick_row_tile(NCp, HW, dtype_bytes, target_block_bytes)

    block_bytes = row_tile * HW * dtype_bytes
    # Ask for enough scoped VMEM for 4 double-buffered blocks plus headroom,
    # but never more than half the chip's physical VMEM.
    vmem_limit = int(min(vmem_cap // 2, max(32 * _MIB, 6 * block_bytes)))

    grid = (NCp // row_tile,)

    out2d = pl.pallas_call(
        functools.partial(_fcsa_kernel, inv_hw=float(1.0 / HW)),
        out_shape=jax.ShapeDtypeStruct((NCp, HW), x_nchw.dtype),
        grid_spec=pltpu.PrefetchScalarGridSpec(
            num_scalar_prefetch=0,
            grid=grid,
            in_specs=[pl.BlockSpec((row_tile, HW), lambda i: (i, 0))],
            out_specs=pl.BlockSpec((row_tile, HW), lambda i: (i, 0)),
        ),
        compiler_params=pltpu.CompilerParams(
            dimension_semantics=("parallel",),
            vmem_limit_bytes=vmem_limit,
        ),
    )(x2d)

    if nc_pad:
        out2d = out2d[:NC]
    return out2d.reshape(N, C, H, W)


def fcsa_reference(x_nchw):
    """Pure-JAX reference matching the PyTorch forward."""
    mean = jnp.mean(x_nchw, axis=(2, 3), keepdims=True)
    return x_nchw * jax.nn.sigmoid(mean)


if __name__ == "__main__":
    key = jax.random.PRNGKey(0)
    # Small shapes consistent with the module: batch=2, channels=4, spatial=16.
    N, C, H, W = 2, 4, 16, 16
    x = jax.random.normal(key, (N, C, H, W), dtype=jnp.float32)

    out = fcsa_forward(x)
    out = jax.block_until_ready(out)

    ref = fcsa_reference(x)
    assert out.shape == (N, C, H, W)
    assert jnp.allclose(out, ref, atol=1e-5, rtol=1e-5), "mismatch vs reference"

    print("KERNEL_OK")
</pallas_src>

<mosaic_0001>
module attributes {stable_mosaic.version = 11 : i64} {
  func.func @_fcsa_kernel(%arg0: i32, %arg1: memref<8x256xf32, #tpu.memory_space<vmem>>, %arg2: memref<8x256xf32, #tpu.memory_space<vmem>>) attributes {dimension_semantics = [#tpu.dimension_semantics<parallel>], iteration_bounds = array<i64: 1>, scalar_prefetch = 0 : i64, scratch_operands = 0 : i64, tpu.core_type = #tpu.core_type<tc>, window_params = [{transform_indices = @transform_0, window_bounds = array<i64: 8, 256>}, {transform_indices = @transform_1, window_bounds = array<i64: 8, 256>}]} {
    %c0 = arith.constant 0 : index
    %c0_0 = arith.constant 0 : index
    %0 = vector.load %arg1[%c0, %c0_0] : memref<8x256xf32, #tpu.memory_space<vmem>>, vector<8x256xf32>
    %cst = arith.constant dense<0.000000e+00> : vector<8xf32>
    %1 = vector.multi_reduction <add>, %0, %cst [1] : vector<8x256xf32> to vector<8xf32>
    %2 = vector.shape_cast %1 : vector<8xf32> to vector<8x1xf32>
    %cst_1 = arith.constant 3.906250e-03 : f32
    %3 = vector.broadcast %cst_1 : f32 to vector<8x1xf32>
    %4 = arith.mulf %2, %3 : vector<8x1xf32>
    %5 = arith.negf %4 : vector<8x1xf32>
    %6 = math.exp %5 : vector<8x1xf32>
    %cst_2 = arith.constant 1.000000e+00 : f32
    %7 = vector.broadcast %cst_2 : f32 to vector<8x1xf32>
    %8 = arith.addf %7, %6 : vector<8x1xf32>
    %9 = arith.divf %7, %8 : vector<8x1xf32>
    %10 = vector.broadcast %9 : vector<8x1xf32> to vector<8x256xf32>
    %11 = arith.mulf %0, %10 : vector<8x256xf32>
    %c0_3 = arith.constant 0 : index
    %c0_4 = arith.constant 0 : index
    %12 = vector.load %arg2[%c0_3, %c0_4] : memref<8x256xf32, #tpu.memory_space<vmem>>, vector<8x256xf32>
    tpu.vector_store %arg2[%c0_3, %c0_4], %11 {strides = array<i32>} : memref<8x256xf32, #tpu.memory_space<vmem>>, vector<8x256xf32>,
    return
  }
  func.func @transform_0(%arg0: i32) -> (i32, i32) {
    %c0_i32 = arith.constant 0 : i32
    %c0_i32_0 = arith.constant 0 : i32
    return %arg0, %c0_i32 : i32, i32
  }
  func.func @transform_1(%arg0: i32) -> (i32, i32) {
    %c0_i32 = arith.constant 0 : i32
    %c0_i32_0 = arith.constant 0 : i32
    return %arg0, %c0_i32 : i32, i32
  }
}

</mosaic_0001>

<bundles_post_ra>
// kernel: tpu_custom_call.1
= control target key start
LH: loop header
LB: loop body
LE: loop exit
PB: predicated region body
PF: predicated region fallthrough
CT: control target
= control target key end

     0   :  { %6 = vsyncpa [#allocation3], 0  ;;  %s146_s0 = inlined_call_operand.hbm [shape: f32[8,256], index: 0, kind: input, shape index: {}]   ;;  %s147_s1 = inlined_call_operand.hbm [shape: f32[8,256], index: 1, kind: output, shape index: {}]  }
   0x1   :  { %7 = vsyncpa [#allocation4], 0  ;;  %s13_s8 = sshll.u32 %s146_s0, 4  ;;  %s128_s9 = smov [#allocation2]   ;;  %s14_s8 = int_to_ptr.hbm [resolvable:$true] %s13_s8 }
   0x2   :  { %s15_s10 = sshll.u32 %s128_s9, 4  ;;  %s16_s10 = int_to_ptr.vmem [resolvable:$true] %s15_s10 }
   0x3   :  { %18 = dma.hbm_to_vmem [thread:$0]  %s14_s8, 256, %s16_s10, [#allocation3]  }
   0x4   :  { %124 = dma.done.wait [#allocation3], 256  }
   0x5   :  { %125 = vsyncadd [#allocation3], 4294967040  ;;  %v23_v0 = vld [vmem:[#allocation2] sm:$0xff]  ;;  %v24_v1 = vld [vmem:[#allocation2 + $0x8] sm:$0xff]  ;;  %s129_s0 = smov [#allocation5]   ;;  %s59_s14 = sshll.u32 %s147_s1, 4  ;;  %s60_s14 = int_to_ptr.hbm [resolvable:$true] %s59_s14 }
   0x6   :  { %v25_v2 = vadd.f32 %v24_v1, %v23_v0  ;;  %s57_s11 = sshll.u32 %s129_s0, 4  ;;  %s58_s11 = int_to_ptr.vmem [resolvable:$true] %s57_s11 }
   0x8   :  { %26 = vadd.xlane.f32.xlu0 %v25_v2 }
  0x7b   :  { %v27_v3 = vpop.xlane.xlu0 %26 }
  0x7c   :  { %v69_v4 = vmul.f32 -0.00390625, %v27_v3 }
  0x7e   :  { %v30_v5 = vmul.f32 1.442695, %v69_v4 }
  0x80   :  { %72 = vpow2.f32 %v30_v5 }
  0x86   :  { %v73_v6 = vpop.eup %72 }
  0x87   :  { %v32_v7 = vadd.f32 1.0, %v73_v6 }
  0x89   :  { %74 = vrcp.f32 %v32_v7  ;;  %v44_v11 = vand.u32 2147483648, %v32_v7  ;;  %v42_v13 = vand.u32 2147483647, %v32_v7  ;;  %vm38_vm1 = vweird.f32 %v32_v7 }
  0x8b   :  { %v45_v15 = vor.u32 1.1754944e-38, %v44_v11  ;;  %vm43_vm3 = vcmp.eq.f32.partialorder %v42_v13, 8.507059e+37 }
  0x8f   :  { %v75_v8 = vpop.eup %74 }
  0x90   :  { %v34_v9 = vmul.f32 %v75_v8, %v32_v7  ;;  %vm39_vm0 = vweird.f32 %v75_v8 }
  0x91   :  { %vm40_vm2 = vmor %vm38_vm1, %vm39_vm0 }
  0x92   :  { %v35_v10 = vsub.f32 1.0, %v34_v9 }
  0x94   :  { %v36_v12 = vmul.f32 %v75_v8, %v35_v10 }
  0x96   :  { %v37_v14 = vadd.f32 %v75_v8, %v36_v12 }
  0x98   :  { %v41_v16 = vsel %vm40_vm2, %v75_v8, %v37_v14 }
  0x99   :  { %v46_v17 = vsel %vm43_vm3, %v45_v15, %v41_v16 }
  0x9a   :  { %v48_v18 = vmul.f32 %v46_v17, %v23_v0  ;;  %v49_v19 = vmul.f32 %v46_v17, %v24_v1 }
  0x9c   :  { %50 = vst [vmem:[#allocation5] sm:$0xff] %v48_v18 }
  0x9d   :  { %51 = vst [vmem:[#allocation5 + $0x8] sm:$0xff] %v49_v19 }
  0x9e   :  { %62 = dma.vmem_to_hbm [thread:$0]  %s58_s11, 256, %s60_s14, [#allocation4]  }
  0x9f   :  { %126 = dma.done.wait [#allocation4], 256  }
  0xa0   :  { %127 = vsyncadd [#allocation4], 4294967040 }
  0xa1   :  { %67 = vsyncpa [#allocation3], 1 }
  0xa2   :  { %68 = vsyncpa [#allocation4], 1 }

</bundles_post_ra>
